<compile_context>
chip_gen: v6e
topology: v6e:2x2x1
jax: 0.10.0
libtpu: 0.0.40
codegen_flags: <defaults>
</compile_context>

<pallas_src>
import functools

import jax
import jax.numpy as jnp
from jax import lax
from jax.experimental import pallas as pl
from jax.experimental.pallas import tpu as pltpu

_MARGIN = 1.0
# partials per batch row:
# [xyz_num, uv_num, vis_cnt, dist_sq, gt_mask_sum, pred_mask_sum, theta_ss, beta_ss]
_N_PARTIALS = 8


def _fused_loss_kernel(pre_xyz_ref, gt_xyz_ref, vis_ref, gt_uv_ref, pre_uv_ref,
                       f1_ref, f2_ref, mask_ref, theta_ref, beta_ref,
                       out_ref, *, mask_w):
    f32 = jnp.float32
    K = gt_uv_ref.shape[1]

    # ---- masked L2 keypoint partials (vis mask shared by xyz and uv) -------
    vis = (vis_ref[...].astype(f32) != 0.0).astype(f32)                 # (TB,K,1)
    dx = pre_xyz_ref[...].astype(f32) - gt_xyz_ref[...].astype(f32)     # (TB,K,3)
    gt_uv = gt_uv_ref[...].astype(f32)                                  # (TB,K,2)
    pre_uv = pre_uv_ref[...].astype(f32)                                # (TB,K,2)
    du = pre_uv - gt_uv
    xyz_num = jnp.sum(vis * jnp.sum(dx * dx, axis=2, keepdims=True), axis=1)  # (TB,1)
    uv_num = jnp.sum(vis * jnp.sum(du * du, axis=2, keepdims=True), axis=1)   # (TB,1)
    vis_cnt = jnp.sum(vis, axis=1)                                            # (TB,1)

    # ---- contrastive per-row squared distance (label applied in epilogue) --
    fd = f1_ref[...].astype(f32) - f2_ref[...].astype(f32) + 1e-6       # (TB,1,F)
    dist_sq = jnp.sum(fd * fd, axis=2)                                  # (TB,1)

    # ---- hand-mask gather: hit counts reduced over K first -----------------
    # torch clamps BOTH coords with hand_mask.shape[-1]-1; kept for parity.
    mask = mask_ref[...].astype(f32)                                    # (TB,1,HW)
    hw = mask.shape[2]
    pix = lax.broadcasted_iota(jnp.int32, (1, 1, hw), 2)                # shared iota

    def mask_hits(uv):
        idx = jnp.clip(uv.astype(jnp.int32), 0, mask_w - 1)             # trunc like .long()
        flat = idx[:, :, 1:2] * mask_w + idx[:, :, 0:1]                 # (TB,K,1) = y*W + x
        counts = jnp.zeros(mask.shape, f32)                             # (TB,1,HW)
        for k in range(K):                                              # static unroll
            counts = counts + (pix == flat[:, k:k + 1, :]).astype(f32)
        return jnp.sum(counts * mask, axis=2)                           # (TB,1)

    gt_msum = mask_hits(gt_uv)
    pred_msum = mask_hits(pre_uv)

    # ---- regularization partials (sqrt in the epilogue) --------------------
    th = theta_ref[...].astype(f32)                                     # (TB,1,P1)
    be = beta_ref[...].astype(f32)                                      # (TB,1,P2)
    theta_ss = jnp.sum(th * th, axis=2)                                 # (TB,1)
    beta_ss = jnp.sum(be * be, axis=2)                                  # (TB,1)

    out_ref[:, 0:1] = xyz_num
    out_ref[:, 1:2] = uv_num
    out_ref[:, 2:3] = vis_cnt
    out_ref[:, 3:4] = dist_sq
    out_ref[:, 4:5] = gt_msum
    out_ref[:, 5:6] = pred_msum
    out_ref[:, 6:7] = theta_ss
    out_ref[:, 7:8] = beta_ss


def _pick_tb(batch, hw):
    """Rows per grid step: as many as fit a conservative per-buffer VMEM budget."""
    row_bytes = max(1, hw) * 4
    cap = max(1, min(32, (2 * 1024 * 1024) // row_bytes))   # ~2 MiB mask block / buffer
    if batch <= cap:
        return batch
    for tb in range(cap, 0, -1):                             # largest divisor <= cap
        if batch % tb == 0:
            return tb
    return 1


@jax.jit
def fused_losses(pre_xyz, gt_xyz, pre_uv, gt_uv, keypoint_vis,
                 hand_mask, theta, beta, feat1, feat2, label):
    B, K, _ = pre_xyz.shape
    H, W = hand_mask.shape[-2], hand_mask.shape[-1]
    HW = H * W
    F = feat1.shape[-1]
    P1, P2 = theta.shape[-1], beta.shape[-1]

    TB = _pick_tb(B, HW)
    G = B // TB

    # metadata-only reshapes (tiny dtype fixes only on scalar-ish inputs)
    vis3 = keypoint_vis.reshape(B, K, 1).astype(jnp.float32)
    mask3 = hand_mask.reshape(B, 1, HW)
    if mask3.dtype == jnp.bool_:
        mask3 = mask3.astype(jnp.float32)
    feat1_3 = feat1.reshape(B, 1, F)
    feat2_3 = feat2.reshape(B, 1, F)
    theta3 = theta.reshape(B, 1, P1)
    beta3 = beta.reshape(B, 1, P2)
    label1 = label.reshape(B).astype(jnp.float32)

    kernel = functools.partial(_fused_loss_kernel, mask_w=W)

    parts = pl.pallas_call(
        kernel,
        grid=(G,),
        in_specs=[
            pl.BlockSpec((TB, K, 3), lambda i: (i, 0, 0)),    # pre_xyz
            pl.BlockSpec((TB, K, 3), lambda i: (i, 0, 0)),    # gt_xyz
            pl.BlockSpec((TB, K, 1), lambda i: (i, 0, 0)),    # keypoint_vis
            pl.BlockSpec((TB, K, 2), lambda i: (i, 0, 0)),    # gt_uv
            pl.BlockSpec((TB, K, 2), lambda i: (i, 0, 0)),    # pre_uv
            pl.BlockSpec((TB, 1, F), lambda i: (i, 0, 0)),    # feat1
            pl.BlockSpec((TB, 1, F), lambda i: (i, 0, 0)),    # feat2
            pl.BlockSpec((TB, 1, HW), lambda i: (i, 0, 0)),   # hand_mask (lane-dense)
            pl.BlockSpec((TB, 1, P1), lambda i: (i, 0, 0)),   # theta
            pl.BlockSpec((TB, 1, P2), lambda i: (i, 0, 0)),   # beta
        ],
        out_specs=pl.BlockSpec((pl.Squeezed(), TB, _N_PARTIALS), lambda i: (i, 0, 0)),
        out_shape=jax.ShapeDtypeStruct((G, TB, _N_PARTIALS), jnp.float32),
        compiler_params=pltpu.CompilerParams(dimension_semantics=("parallel",)),
    )(pre_xyz, gt_xyz, vis3, gt_uv, pre_uv, feat1_3, feat2_3, mask3, theta3, beta3)

    # tiny fused epilogue on (B,) vectors (kept off the kernel critical path)
    parts = parts.reshape(B, _N_PARTIALS)
    xyz_num = jnp.sum(parts[:, 0])
    uv_num = jnp.sum(parts[:, 1])
    vis_tot = jnp.sum(parts[:, 2])
    dist_sq = parts[:, 3]
    gt_msum = jnp.sum(parts[:, 4])
    pred_msum = jnp.sum(parts[:, 5])
    theta_ss = jnp.sum(parts[:, 6])
    beta_ss = jnp.sum(parts[:, 7])

    denom = jnp.maximum(vis_tot, 1.0)
    loss_xyz = jnp.where(vis_tot > 0, xyz_num / denom, jnp.float32(0.0))
    loss_uv = jnp.where(vis_tot > 0, uv_num / denom, jnp.float32(0.0))

    dist = jnp.sqrt(dist_sq)
    hinge = jnp.maximum(_MARGIN - dist, 0.0)
    loss_contrast = jnp.mean((1.0 - label1) * dist_sq + label1 * hinge * hinge)

    loss_hand_mask = 1.0 - pred_msum / (gt_msum + 1e-8)
    loss_reg = (jnp.sqrt(theta_ss) + 10.0 * jnp.sqrt(beta_ss)) / 100.0
    return loss_xyz, loss_uv, loss_contrast, loss_hand_mask, loss_reg


class LossCalculation:
    def __init__(self, loss_type='L2', comp_xyz_loss=False, comp_uv_loss=False,
                 comp_contrastive_loss=False, comp_hand_mask_loss=False,
                 comp_regularization_loss=False):
        # Original module asserts loss_type in ['L2', 'L2'] -> only L2 reachable.
        assert loss_type == 'L2'
        self.comp_xyz_loss = comp_xyz_loss
        self.comp_uv_loss = comp_uv_loss
        self.comp_contrastive_loss = comp_contrastive_loss
        self.comp_hand_mask_loss = comp_hand_mask_loss
        self.comp_regularization_loss = comp_regularization_loss

    def __call__(self, pre_xyz, gt_xyz, pre_uv, gt_uv, keypoint_vis,
                 hand_mask=None, theta=None, beta=None,
                 feat1=None, feat2=None, label=None):
        B = pre_xyz.shape[0]
        # tiny dummies for disabled / missing optional inputs so the single
        # fused kernel covers every flag combination (disabled results -> None)
        if hand_mask is None:
            hand_mask = jnp.zeros((B, 1, 1), jnp.float32)
        if theta is None:
            theta = jnp.zeros((B, 1), jnp.float32)
        if beta is None:
            beta = jnp.zeros((B, 1), jnp.float32)
        if feat1 is None:
            feat1 = jnp.zeros((B, 1), jnp.float32)
        if feat2 is None:
            feat2 = jnp.zeros((B, 1), jnp.float32)
        if label is None:
            label = jnp.zeros((B,), jnp.float32)

        loss_xyz, loss_uv, loss_contrast, loss_hand_mask, loss_reg = fused_losses(
            pre_xyz, gt_xyz, pre_uv, gt_uv, keypoint_vis,
            hand_mask, theta, beta, feat1, feat2, label)

        return (loss_xyz if self.comp_xyz_loss else None,
                loss_uv if self.comp_uv_loss else None,
                loss_contrast if self.comp_contrastive_loss else None,
                loss_hand_mask if self.comp_hand_mask_loss else None,
                loss_reg if self.comp_regularization_loss else None)


# ----------------------------------------------------------------------------
if __name__ == "__main__":
    key = jax.random.PRNGKey(0)
    ks = jax.random.split(key, 12)

    B, K, H, W, F = 2, 8, 16, 16, 32

    pre_xyz = jax.random.normal(ks[0], (B, K, 3), jnp.float32)
    gt_xyz = jax.random.normal(ks[1], (B, K, 3), jnp.float32)
    pre_uv = jax.random.uniform(ks[2], (B, K, 2), jnp.float32, 0.0, W)
    gt_uv = jax.random.uniform(ks[3], (B, K, 2), jnp.float32, 0.0, W)
    keypoint_vis = (jax.random.uniform(ks[4], (B, K, 1)) > 0.3).astype(jnp.float32)
    hand_mask = (jax.random.uniform(ks[5], (B, H, W)) > 0.5).astype(jnp.float32)
    theta = jax.random.normal(ks[6], (B, 45), jnp.float32)
    beta = jax.random.normal(ks[7], (B, 10), jnp.float32)
    feat1 = jax.random.normal(ks[8], (B, F), jnp.float32)
    feat2 = jax.random.normal(ks[9], (B, F), jnp.float32)
    label = (jax.random.uniform(ks[10], (B,)) > 0.5).astype(jnp.float32)

    loss_calc = LossCalculation(
        loss_type='L2',
        comp_xyz_loss=True, comp_uv_loss=True, comp_contrastive_loss=True,
        comp_hand_mask_loss=True, comp_regularization_loss=True)

    out = loss_calc(pre_xyz, gt_xyz, pre_uv, gt_uv, keypoint_vis,
                    hand_mask=hand_mask, theta=theta, beta=beta,
                    feat1=feat1, feat2=feat2, label=label)
    out = jax.block_until_ready(out)
    print("KERNEL_OK")
</pallas_src>

<mosaic_0001>
module attributes {stable_mosaic.version = 11 : i64} {
  func.func @_fused_loss_kernel(%arg0: i32, %arg1: memref<2x8x3xf32, #tpu.memory_space<vmem>>, %arg2: memref<2x8x3xf32, #tpu.memory_space<vmem>>, %arg3: memref<2x8x1xf32, #tpu.memory_space<vmem>>, %arg4: memref<2x8x2xf32, #tpu.memory_space<vmem>>, %arg5: memref<2x8x2xf32, #tpu.memory_space<vmem>>, %arg6: memref<2x1x32xf32, #tpu.memory_space<vmem>>, %arg7: memref<2x1x32xf32, #tpu.memory_space<vmem>>, %arg8: memref<2x1x256xf32, #tpu.memory_space<vmem>>, %arg9: memref<2x1x45xf32, #tpu.memory_space<vmem>>, %arg10: memref<2x1x10xf32, #tpu.memory_space<vmem>>, %arg11: memref<1x2x8xf32, #tpu.memory_space<vmem>>) attributes {dimension_semantics = [#tpu.dimension_semantics<parallel>], iteration_bounds = array<i64: 1>, scalar_prefetch = 0 : i64, scratch_operands = 0 : i64, tpu.core_type = #tpu.core_type<tc>, window_params = [{transform_indices = @transform_0, window_bounds = array<i64: 2, 8, 3>}, {transform_indices = @transform_1, window_bounds = array<i64: 2, 8, 3>}, {transform_indices = @transform_2, window_bounds = array<i64: 2, 8, 1>}, {transform_indices = @transform_3, window_bounds = array<i64: 2, 8, 2>}, {transform_indices = @transform_4, window_bounds = array<i64: 2, 8, 2>}, {transform_indices = @transform_5, window_bounds = array<i64: 2, 1, 32>}, {transform_indices = @transform_6, window_bounds = array<i64: 2, 1, 32>}, {transform_indices = @transform_7, window_bounds = array<i64: 2, 1, 256>}, {transform_indices = @transform_8, window_bounds = array<i64: 2, 1, 45>}, {transform_indices = @transform_9, window_bounds = array<i64: 2, 1, 10>}, {transform_indices = @transform_10, window_bounds = array<i64: 1, 2, 8>}]} {
    %c0 = arith.constant 0 : index
    %c0_0 = arith.constant 0 : index
    %c0_1 = arith.constant 0 : index
    %0 = vector.load %arg3[%c0, %c0_0, %c0_1] : memref<2x8x1xf32, #tpu.memory_space<vmem>>, vector<2x8x1xf32>
    %cst = arith.constant 0.000000e+00 : f32
    %1 = vector.broadcast %cst : f32 to vector<2x8x1xf32>
    %2 = arith.cmpf one, %0, %1 : vector<2x8x1xf32>
    %3 = arith.extui %2 : vector<2x8x1xi1> to vector<2x8x1xi32>
    %4 = arith.sitofp %3 : vector<2x8x1xi32> to vector<2x8x1xf32>
    %c0_2 = arith.constant 0 : index
    %c0_3 = arith.constant 0 : index
    %c0_4 = arith.constant 0 : index
    %5 = vector.load %arg1[%c0_2, %c0_3, %c0_4] : memref<2x8x3xf32, #tpu.memory_space<vmem>>, vector<2x8x3xf32>
    %c0_5 = arith.constant 0 : index
    %c0_6 = arith.constant 0 : index
    %c0_7 = arith.constant 0 : index
    %6 = vector.load %arg2[%c0_5, %c0_6, %c0_7] : memref<2x8x3xf32, #tpu.memory_space<vmem>>, vector<2x8x3xf32>
    %7 = arith.subf %5, %6 : vector<2x8x3xf32>
    %c0_8 = arith.constant 0 : index
    %c0_9 = arith.constant 0 : index
    %c0_10 = arith.constant 0 : index
    %8 = vector.load %arg4[%c0_8, %c0_9, %c0_10] : memref<2x8x2xf32, #tpu.memory_space<vmem>>, vector<2x8x2xf32>
    %c0_11 = arith.constant 0 : index
    %c0_12 = arith.constant 0 : index
    %c0_13 = arith.constant 0 : index
    %9 = vector.load %arg5[%c0_11, %c0_12, %c0_13] : memref<2x8x2xf32, #tpu.memory_space<vmem>>, vector<2x8x2xf32>
    %10 = arith.subf %9, %8 : vector<2x8x2xf32>
    %11 = arith.mulf %7, %7 : vector<2x8x3xf32>
    %cst_14 = arith.constant dense<0.000000e+00> : vector<2x8xf32>
    %12 = vector.multi_reduction <add>, %11, %cst_14 [2] : vector<2x8x3xf32> to vector<2x8xf32>
    %13 = vector.shape_cast %12 : vector<2x8xf32> to vector<2x8x1xf32>
    %14 = arith.mulf %4, %13 : vector<2x8x1xf32>
    %cst_15 = arith.constant dense<0.000000e+00> : vector<2x1xf32>
    %15 = vector.multi_reduction <add>, %14, %cst_15 [1] : vector<2x8x1xf32> to vector<2x1xf32>
    %16 = arith.mulf %10, %10 : vector<2x8x2xf32>
    %cst_16 = arith.constant dense<0.000000e+00> : vector<2x8xf32>
    %17 = vector.multi_reduction <add>, %16, %cst_16 [2] : vector<2x8x2xf32> to vector<2x8xf32>
    %18 = vector.shape_cast %17 : vector<2x8xf32> to vector<2x8x1xf32>
    %19 = arith.mulf %4, %18 : vector<2x8x1xf32>
    %cst_17 = arith.constant dense<0.000000e+00> : vector<2x1xf32>
    %20 = vector.multi_reduction <add>, %19, %cst_17 [1] : vector<2x8x1xf32> to vector<2x1xf32>
    %cst_18 = arith.constant dense<0.000000e+00> : vector<2x1xf32>
    %21 = vector.multi_reduction <add>, %4, %cst_18 [1] : vector<2x8x1xf32> to vector<2x1xf32>
    %c0_19 = arith.constant 0 : index
    %c0_20 = arith.constant 0 : index
    %c0_21 = arith.constant 0 : index
    %22 = vector.load %arg6[%c0_19, %c0_20, %c0_21] : memref<2x1x32xf32, #tpu.memory_space<vmem>>, vector<2x1x32xf32>
    %c0_22 = arith.constant 0 : index
    %c0_23 = arith.constant 0 : index
    %c0_24 = arith.constant 0 : index
    %23 = vector.load %arg7[%c0_22, %c0_23, %c0_24] : memref<2x1x32xf32, #tpu.memory_space<vmem>>, vector<2x1x32xf32>
    %24 = arith.subf %22, %23 : vector<2x1x32xf32>
    %cst_25 = arith.constant 9.99999997E-7 : f32
    %25 = vector.broadcast %cst_25 : f32 to vector<2x1x32xf32>
    %26 = arith.addf %24, %25 : vector<2x1x32xf32>
    %27 = arith.mulf %26, %26 : vector<2x1x32xf32>
    %cst_26 = arith.constant dense<0.000000e+00> : vector<2x1xf32>
    %28 = vector.multi_reduction <add>, %27, %cst_26 [2] : vector<2x1x32xf32> to vector<2x1xf32>
    %c0_27 = arith.constant 0 : index
    %c0_28 = arith.constant 0 : index
    %c0_29 = arith.constant 0 : index
    %29 = vector.load %arg8[%c0_27, %c0_28, %c0_29] : memref<2x1x256xf32, #tpu.memory_space<vmem>>, vector<2x1x256xf32>
    %30 = tpu.iota {dimensions = array<i32: 2>} : vector<1x1x256xi32>
    %31 = arith.fptosi %8 : vector<2x8x2xf32> to vector<2x8x2xi32>
    %c0_i32 = arith.constant 0 : i32
    %c15_i32 = arith.constant 15 : i32
    %32 = vector.broadcast %c0_i32 : i32 to vector<2x8x2xi32>
    %33 = arith.maxsi %32, %31 : vector<2x8x2xi32>
    %34 = vector.broadcast %c15_i32 : i32 to vector<2x8x2xi32>
    %35 = arith.minsi %34, %33 : vector<2x8x2xi32>
    %36 = vector.extract_strided_slice %35 {offsets = [0, 0, 1], sizes = [2, 8, 1], strides = [1, 1, 1]} : vector<2x8x2xi32> to vector<2x8x1xi32>
    %c16_i32 = arith.constant 16 : i32
    %37 = vector.broadcast %c16_i32 : i32 to vector<2x8x1xi32>
    %38 = arith.muli %36, %37 : vector<2x8x1xi32>
    %39 = vector.extract_strided_slice %35 {offsets = [0, 0, 0], sizes = [2, 8, 1], strides = [1, 1, 1]} : vector<2x8x2xi32> to vector<2x8x1xi32>
    %40 = arith.addi %38, %39 : vector<2x8x1xi32>
    %cst_30 = arith.constant 0.000000e+00 : f32
    %41 = vector.broadcast %cst_30 : f32 to vector<2x1x256xf32>
    %42 = vector.extract_strided_slice %40 {offsets = [0, 0, 0], sizes = [2, 1, 1], strides = [1, 1, 1]} : vector<2x8x1xi32> to vector<2x1x1xi32>
    %43 = vector.broadcast %30 : vector<1x1x256xi32> to vector<2x1x256xi32>
    %44 = vector.broadcast %42 : vector<2x1x1xi32> to vector<2x1x256xi32>
    %45 = arith.cmpi eq, %43, %44 : vector<2x1x256xi32>
    %46 = arith.extui %45 : vector<2x1x256xi1> to vector<2x1x256xi32>
    %47 = arith.sitofp %46 : vector<2x1x256xi32> to vector<2x1x256xf32>
    %48 = arith.addf %41, %47 : vector<2x1x256xf32>
    %49 = vector.extract_strided_slice %40 {offsets = [0, 1, 0], sizes = [2, 1, 1], strides = [1, 1, 1]} : vector<2x8x1xi32> to vector<2x1x1xi32>
    %50 = vector.broadcast %30 : vector<1x1x256xi32> to vector<2x1x256xi32>
    %51 = vector.broadcast %49 : vector<2x1x1xi32> to vector<2x1x256xi32>
    %52 = arith.cmpi eq, %50, %51 : vector<2x1x256xi32>
    %53 = arith.extui %52 : vector<2x1x256xi1> to vector<2x1x256xi32>
    %54 = arith.sitofp %53 : vector<2x1x256xi32> to vector<2x1x256xf32>
    %55 = arith.addf %48, %54 : vector<2x1x256xf32>
    %56 = vector.extract_strided_slice %40 {offsets = [0, 2, 0], sizes = [2, 1, 1], strides = [1, 1, 1]} : vector<2x8x1xi32> to vector<2x1x1xi32>
    %57 = vector.broadcast %30 : vector<1x1x256xi32> to vector<2x1x256xi32>
    %58 = vector.broadcast %56 : vector<2x1x1xi32> to vector<2x1x256xi32>
    %59 = arith.cmpi eq, %57, %58 : vector<2x1x256xi32>
    %60 = arith.extui %59 : vector<2x1x256xi1> to vector<2x1x256xi32>
    %61 = arith.sitofp %60 : vector<2x1x256xi32> to vector<2x1x256xf32>
    %62 = arith.addf %55, %61 : vector<2x1x256xf32>
    %63 = vector.extract_strided_slice %40 {offsets = [0, 3, 0], sizes = [2, 1, 1], strides = [1, 1, 1]} : vector<2x8x1xi32> to vector<2x1x1xi32>
    %64 = vector.broadcast %30 : vector<1x1x256xi32> to vector<2x1x256xi32>
    %65 = vector.broadcast %63 : vector<2x1x1xi32> to vector<2x1x256xi32>
    %66 = arith.cmpi eq, %64, %65 : vector<2x1x256xi32>
    %67 = arith.extui %66 : vector<2x1x256xi1> to vector<2x1x256xi32>
    %68 = arith.sitofp %67 : vector<2x1x256xi32> to vector<2x1x256xf32>
    %69 = arith.addf %62, %68 : vector<2x1x256xf32>
    %70 = vector.extract_strided_slice %40 {offsets = [0, 4, 0], sizes = [2, 1, 1], strides = [1, 1, 1]} : vector<2x8x1xi32> to vector<2x1x1xi32>
    %71 = vector.broadcast %30 : vector<1x1x256xi32> to vector<2x1x256xi32>
    %72 = vector.broadcast %70 : vector<2x1x1xi32> to vector<2x1x256xi32>
    %73 = arith.cmpi eq, %71, %72 : vector<2x1x256xi32>
    %74 = arith.extui %73 : vector<2x1x256xi1> to vector<2x1x256xi32>
    %75 = arith.sitofp %74 : vector<2x1x256xi32> to vector<2x1x256xf32>
    %76 = arith.addf %69, %75 : vector<2x1x256xf32>
    %77 = vector.extract_strided_slice %40 {offsets = [0, 5, 0], sizes = [2, 1, 1], strides = [1, 1, 1]} : vector<2x8x1xi32> to vector<2x1x1xi32>
    %78 = vector.broadcast %30 : vector<1x1x256xi32> to vector<2x1x256xi32>
    %79 = vector.broadcast %77 : vector<2x1x1xi32> to vector<2x1x256xi32>
    %80 = arith.cmpi eq, %78, %79 : vector<2x1x256xi32>
    %81 = arith.extui %80 : vector<2x1x256xi1> to vector<2x1x256xi32>
    %82 = arith.sitofp %81 : vector<2x1x256xi32> to vector<2x1x256xf32>
    %83 = arith.addf %76, %82 : vector<2x1x256xf32>
    %84 = vector.extract_strided_slice %40 {offsets = [0, 6, 0], sizes = [2, 1, 1], strides = [1, 1, 1]} : vector<2x8x1xi32> to vector<2x1x1xi32>
    %85 = vector.broadcast %30 : vector<1x1x256xi32> to vector<2x1x256xi32>
    %86 = vector.broadcast %84 : vector<2x1x1xi32> to vector<2x1x256xi32>
    %87 = arith.cmpi eq, %85, %86 : vector<2x1x256xi32>
    %88 = arith.extui %87 : vector<2x1x256xi1> to vector<2x1x256xi32>
    %89 = arith.sitofp %88 : vector<2x1x256xi32> to vector<2x1x256xf32>
    %90 = arith.addf %83, %89 : vector<2x1x256xf32>
    %91 = vector.extract_strided_slice %40 {offsets = [0, 7, 0], sizes = [2, 1, 1], strides = [1, 1, 1]} : vector<2x8x1xi32> to vector<2x1x1xi32>
    %92 = vector.broadcast %30 : vector<1x1x256xi32> to vector<2x1x256xi32>
    %93 = vector.broadcast %91 : vector<2x1x1xi32> to vector<2x1x256xi32>
    %94 = arith.cmpi eq, %92, %93 : vector<2x1x256xi32>
    %95 = arith.extui %94 : vector<2x1x256xi1> to vector<2x1x256xi32>
    %96 = arith.sitofp %95 : vector<2x1x256xi32> to vector<2x1x256xf32>
    %97 = arith.addf %90, %96 : vector<2x1x256xf32>
    %98 = arith.mulf %97, %29 : vector<2x1x256xf32>
    %cst_31 = arith.constant dense<0.000000e+00> : vector<2x1xf32>
    %99 = vector.multi_reduction <add>, %98, %cst_31 [2] : vector<2x1x256xf32> to vector<2x1xf32>
    %100 = arith.fptosi %9 : vector<2x8x2xf32> to vector<2x8x2xi32>
    %c0_i32_32 = arith.constant 0 : i32
    %c15_i32_33 = arith.constant 15 : i32
    %101 = vector.broadcast %c0_i32_32 : i32 to vector<2x8x2xi32>
    %102 = arith.maxsi %101, %100 : vector<2x8x2xi32>
    %103 = vector.broadcast %c15_i32_33 : i32 to vector<2x8x2xi32>
    %104 = arith.minsi %103, %102 : vector<2x8x2xi32>
    %105 = vector.extract_strided_slice %104 {offsets = [0, 0, 1], sizes = [2, 8, 1], strides = [1, 1, 1]} : vector<2x8x2xi32> to vector<2x8x1xi32>
    %c16_i32_34 = arith.constant 16 : i32
    %106 = vector.broadcast %c16_i32_34 : i32 to vector<2x8x1xi32>
    %107 = arith.muli %105, %106 : vector<2x8x1xi32>
    %108 = vector.extract_strided_slice %104 {offsets = [0, 0, 0], sizes = [2, 8, 1], strides = [1, 1, 1]} : vector<2x8x2xi32> to vector<2x8x1xi32>
    %109 = arith.addi %107, %108 : vector<2x8x1xi32>
    %cst_35 = arith.constant 0.000000e+00 : f32
    %110 = vector.broadcast %cst_35 : f32 to vector<2x1x256xf32>
    %111 = vector.extract_strided_slice %109 {offsets = [0, 0, 0], sizes = [2, 1, 1], strides = [1, 1, 1]} : vector<2x8x1xi32> to vector<2x1x1xi32>
    %112 = vector.broadcast %30 : vector<1x1x256xi32> to vector<2x1x256xi32>
    %113 = vector.broadcast %111 : vector<2x1x1xi32> to vector<2x1x256xi32>
    %114 = arith.cmpi eq, %112, %113 : vector<2x1x256xi32>
    %115 = arith.extui %114 : vector<2x1x256xi1> to vector<2x1x256xi32>
    %116 = arith.sitofp %115 : vector<2x1x256xi32> to vector<2x1x256xf32>
    %117 = arith.addf %110, %116 : vector<2x1x256xf32>
    %118 = vector.extract_strided_slice %109 {offsets = [0, 1, 0], sizes = [2, 1, 1], strides = [1, 1, 1]} : vector<2x8x1xi32> to vector<2x1x1xi32>
    %119 = vector.broadcast %30 : vector<1x1x256xi32> to vector<2x1x256xi32>
    %120 = vector.broadcast %118 : vector<2x1x1xi32> to vector<2x1x256xi32>
    %121 = arith.cmpi eq, %119, %120 : vector<2x1x256xi32>
    %122 = arith.extui %121 : vector<2x1x256xi1> to vector<2x1x256xi32>
    %123 = arith.sitofp %122 : vector<2x1x256xi32> to vector<2x1x256xf32>
    %124 = arith.addf %117, %123 : vector<2x1x256xf32>
    %125 = vector.extract_strided_slice %109 {offsets = [0, 2, 0], sizes = [2, 1, 1], strides = [1, 1, 1]} : vector<2x8x1xi32> to vector<2x1x1xi32>
    %126 = vector.broadcast %30 : vector<1x1x256xi32> to vector<2x1x256xi32>
    %127 = vector.broadcast %125 : vector<2x1x1xi32> to vector<2x1x256xi32>
    %128 = arith.cmpi eq, %126, %127 : vector<2x1x256xi32>
    %129 = arith.extui %128 : vector<2x1x256xi1> to vector<2x1x256xi32>
    %130 = arith.sitofp %129 : vector<2x1x256xi32> to vector<2x1x256xf32>
    %131 = arith.addf %124, %130 : vector<2x1x256xf32>
    %132 = vector.extract_strided_slice %109 {offsets = [0, 3, 0], sizes = [2, 1, 1], strides = [1, 1, 1]} : vector<2x8x1xi32> to vector<2x1x1xi32>
    %133 = vector.broadcast %30 : vector<1x1x256xi32> to vector<2x1x256xi32>
    %134 = vector.broadcast %132 : vector<2x1x1xi32> to vector<2x1x256xi32>
    %135 = arith.cmpi eq, %133, %134 : vector<2x1x256xi32>
    %136 = arith.extui %135 : vector<2x1x256xi1> to vector<2x1x256xi32>
    %137 = arith.sitofp %136 : vector<2x1x256xi32> to vector<2x1x256xf32>
    %138 = arith.addf %131, %137 : vector<2x1x256xf32>
    %139 = vector.extract_strided_slice %109 {offsets = [0, 4, 0], sizes = [2, 1, 1], strides = [1, 1, 1]} : vector<2x8x1xi32> to vector<2x1x1xi32>
    %140 = vector.broadcast %30 : vector<1x1x256xi32> to vector<2x1x256xi32>
    %141 = vector.broadcast %139 : vector<2x1x1xi32> to vector<2x1x256xi32>
    %142 = arith.cmpi eq, %140, %141 : vector<2x1x256xi32>
    %143 = arith.extui %142 : vector<2x1x256xi1> to vector<2x1x256xi32>
    %144 = arith.sitofp %143 : vector<2x1x256xi32> to vector<2x1x256xf32>
    %145 = arith.addf %138, %144 : vector<2x1x256xf32>
    %146 = vector.extract_strided_slice %109 {offsets = [0, 5, 0], sizes = [2, 1, 1], strides = [1, 1, 1]} : vector<2x8x1xi32> to vector<2x1x1xi32>
    %147 = vector.broadcast %30 : vector<1x1x256xi32> to vector<2x1x256xi32>
    %148 = vector.broadcast %146 : vector<2x1x1xi32> to vector<2x1x256xi32>
    %149 = arith.cmpi eq, %147, %148 : vector<2x1x256xi32>
    %150 = arith.extui %149 : vector<2x1x256xi1> to vector<2x1x256xi32>
    %151 = arith.sitofp %150 : vector<2x1x256xi32> to vector<2x1x256xf32>
    %152 = arith.addf %145, %151 : vector<2x1x256xf32>
    %153 = vector.extract_strided_slice %109 {offsets = [0, 6, 0], sizes = [2, 1, 1], strides = [1, 1, 1]} : vector<2x8x1xi32> to vector<2x1x1xi32>
    %154 = vector.broadcast %30 : vector<1x1x256xi32> to vector<2x1x256xi32>
    %155 = vector.broadcast %153 : vector<2x1x1xi32> to vector<2x1x256xi32>
    %156 = arith.cmpi eq, %154, %155 : vector<2x1x256xi32>
    %157 = arith.extui %156 : vector<2x1x256xi1> to vector<2x1x256xi32>
    %158 = arith.sitofp %157 : vector<2x1x256xi32> to vector<2x1x256xf32>
    %159 = arith.addf %152, %158 : vector<2x1x256xf32>
    %160 = vector.extract_strided_slice %109 {offsets = [0, 7, 0], sizes = [2, 1, 1], strides = [1, 1, 1]} : vector<2x8x1xi32> to vector<2x1x1xi32>
    %161 = vector.broadcast %30 : vector<1x1x256xi32> to vector<2x1x256xi32>
    %162 = vector.broadcast %160 : vector<2x1x1xi32> to vector<2x1x256xi32>
    %163 = arith.cmpi eq, %161, %162 : vector<2x1x256xi32>
    %164 = arith.extui %163 : vector<2x1x256xi1> to vector<2x1x256xi32>
    %165 = arith.sitofp %164 : vector<2x1x256xi32> to vector<2x1x256xf32>
    %166 = arith.addf %159, %165 : vector<2x1x256xf32>
    %167 = arith.mulf %166, %29 : vector<2x1x256xf32>
    %cst_36 = arith.constant dense<0.000000e+00> : vector<2x1xf32>
    %168 = vector.multi_reduction <add>, %167, %cst_36 [2] : vector<2x1x256xf32> to vector<2x1xf32>
    %c0_37 = arith.constant 0 : index
    %c0_38 = arith.constant 0 : index
    %c0_39 = arith.constant 0 : index
    %169 = vector.load %arg9[%c0_37, %c0_38, %c0_39] : memref<2x1x45xf32, #tpu.memory_space<vmem>>, vector<2x1x45xf32>
    %c0_40 = arith.constant 0 : index
    %c0_41 = arith.constant 0 : index
    %c0_42 = arith.constant 0 : index
    %170 = vector.load %arg10[%c0_40, %c0_41, %c0_42] : memref<2x1x10xf32, #tpu.memory_space<vmem>>, vector<2x1x10xf32>
    %171 = arith.mulf %169, %169 : vector<2x1x45xf32>
    %cst_43 = arith.constant dense<0.000000e+00> : vector<2x1xf32>
    %172 = vector.multi_reduction <add>, %171, %cst_43 [2] : vector<2x1x45xf32> to vector<2x1xf32>
    %173 = arith.mulf %170, %170 : vector<2x1x10xf32>
    %cst_44 = arith.constant dense<0.000000e+00> : vector<2x1xf32>
    %174 = vector.multi_reduction <add>, %173, %cst_44 [2] : vector<2x1x10xf32> to vector<2x1xf32>
    %c0_45 = arith.constant 0 : index
    %c0_46 = arith.constant 0 : index
    %c0_47 = arith.constant 0 : index
    %175 = vector.load %arg11[%c0_45, %c0_46, %c0_47] : memref<1x2x8xf32, #tpu.memory_space<vmem>>, vector<1x2x1xf32>
    %176 = vector.shape_cast %175 : vector<1x2x1xf32> to vector<2x1xf32>
    %177 = vector.shape_cast %15 : vector<2x1xf32> to vector<1x2x1xf32>
    tpu.vector_store %arg11[%c0_45, %c0_46, %c0_47], %177 {strides = array<i32>} : memref<1x2x8xf32, #tpu.memory_space<vmem>>, vector<1x2x1xf32>,
    %c0_48 = arith.constant 0 : index
    %c0_49 = arith.constant 0 : index
    %c1 = arith.constant 1 : index
    %178 = vector.load %arg11[%c0_48, %c0_49, %c1] : memref<1x2x8xf32, #tpu.memory_space<vmem>>, vector<1x2x1xf32>
    %179 = vector.shape_cast %178 : vector<1x2x1xf32> to vector<2x1xf32>
    %180 = vector.shape_cast %20 : vector<2x1xf32> to vector<1x2x1xf32>
    tpu.vector_store %arg11[%c0_48, %c0_49, %c1], %180 {strides = array<i32>} : memref<1x2x8xf32, #tpu.memory_space<vmem>>, vector<1x2x1xf32>,
    %c0_50 = arith.constant 0 : index
    %c0_51 = arith.constant 0 : index
    %c2 = arith.constant 2 : index
    %181 = vector.load %arg11[%c0_50, %c0_51, %c2] : memref<1x2x8xf32, #tpu.memory_space<vmem>>, vector<1x2x1xf32>
    %182 = vector.shape_cast %181 : vector<1x2x1xf32> to vector<2x1xf32>
    %183 = vector.shape_cast %21 : vector<2x1xf32> to vector<1x2x1xf32>
    tpu.vector_store %arg11[%c0_50, %c0_51, %c2], %183 {strides = array<i32>} : memref<1x2x8xf32, #tpu.memory_space<vmem>>, vector<1x2x1xf32>,
    %c0_52 = arith.constant 0 : index
    %c0_53 = arith.constant 0 : index
    %c3 = arith.constant 3 : index
    %184 = vector.load %arg11[%c0_52, %c0_53, %c3] : memref<1x2x8xf32, #tpu.memory_space<vmem>>, vector<1x2x1xf32>
    %185 = vector.shape_cast %184 : vector<1x2x1xf32> to vector<2x1xf32>
    %186 = vector.shape_cast %28 : vector<2x1xf32> to vector<1x2x1xf32>
    tpu.vector_store %arg11[%c0_52, %c0_53, %c3], %186 {strides = array<i32>} : memref<1x2x8xf32, #tpu.memory_space<vmem>>, vector<1x2x1xf32>,
    %c0_54 = arith.constant 0 : index
    %c0_55 = arith.constant 0 : index
    %c4 = arith.constant 4 : index
    %187 = vector.load %arg11[%c0_54, %c0_55, %c4] : memref<1x2x8xf32, #tpu.memory_space<vmem>>, vector<1x2x1xf32>
    %188 = vector.shape_cast %187 : vector<1x2x1xf32> to vector<2x1xf32>
    %189 = vector.shape_cast %99 : vector<2x1xf32> to vector<1x2x1xf32>
    tpu.vector_store %arg11[%c0_54, %c0_55, %c4], %189 {strides = array<i32>} : memref<1x2x8xf32, #tpu.memory_space<vmem>>, vector<1x2x1xf32>,
    %c0_56 = arith.constant 0 : index
    %c0_57 = arith.constant 0 : index
    %c5 = arith.constant 5 : index
    %190 = vector.load %arg11[%c0_56, %c0_57, %c5] : memref<1x2x8xf32, #tpu.memory_space<vmem>>, vector<1x2x1xf32>
    %191 = vector.shape_cast %190 : vector<1x2x1xf32> to vector<2x1xf32>
    %192 = vector.shape_cast %168 : vector<2x1xf32> to vector<1x2x1xf32>
    tpu.vector_store %arg11[%c0_56, %c0_57, %c5], %192 {strides = array<i32>} : memref<1x2x8xf32, #tpu.memory_space<vmem>>, vector<1x2x1xf32>,
    %c0_58 = arith.constant 0 : index
    %c0_59 = arith.constant 0 : index
    %c6 = arith.constant 6 : index
    %193 = vector.load %arg11[%c0_58, %c0_59, %c6] : memref<1x2x8xf32, #tpu.memory_space<vmem>>, vector<1x2x1xf32>
    %194 = vector.shape_cast %193 : vector<1x2x1xf32> to vector<2x1xf32>
    %195 = vector.shape_cast %172 : vector<2x1xf32> to vector<1x2x1xf32>
    tpu.vector_store %arg11[%c0_58, %c0_59, %c6], %195 {strides = array<i32>} : memref<1x2x8xf32, #tpu.memory_space<vmem>>, vector<1x2x1xf32>,
    %c0_60 = arith.constant 0 : index
    %c0_61 = arith.constant 0 : index
    %c7 = arith.constant 7 : index
    %196 = vector.load %arg11[%c0_60, %c0_61, %c7] : memref<1x2x8xf32, #tpu.memory_space<vmem>>, vector<1x2x1xf32>
    %197 = vector.shape_cast %196 : vector<1x2x1xf32> to vector<2x1xf32>
    %198 = vector.shape_cast %174 : vector<2x1xf32> to vector<1x2x1xf32>
    tpu.vector_store %arg11[%c0_60, %c0_61, %c7], %198 {strides = array<i32>} : memref<1x2x8xf32, #tpu.memory_space<vmem>>, vector<1x2x1xf32>,
    return
  }
  func.func @transform_0(%arg0: i32) -> (i32, i32, i32) {
    %c0_i32 = arith.constant 0 : i32
    %c0_i32_0 = arith.constant 0 : i32
    %c0_i32_1 = arith.constant 0 : i32
    return %arg0, %c0_i32, %c0_i32_0 : i32, i32, i32
  }
  func.func @transform_1(%arg0: i32) -> (i32, i32, i32) {
    %c0_i32 = arith.constant 0 : i32
    %c0_i32_0 = arith.constant 0 : i32
    %c0_i32_1 = arith.constant 0 : i32
    return %arg0, %c0_i32, %c0_i32_0 : i32, i32, i32
  }
  func.func @transform_2(%arg0: i32) -> (i32, i32, i32) {
    %c0_i32 = arith.constant 0 : i32
    %c0_i32_0 = arith.constant 0 : i32
    %c0_i32_1 = arith.constant 0 : i32
    return %arg0, %c0_i32, %c0_i32_0 : i32, i32, i32
  }
  func.func @transform_3(%arg0: i32) -> (i32, i32, i32) {
    %c0_i32 = arith.constant 0 : i32
    %c0_i32_0 = arith.constant 0 : i32
    %c0_i32_1 = arith.constant 0 : i32
    return %arg0, %c0_i32, %c0_i32_0 : i32, i32, i32
  }
  func.func @transform_4(%arg0: i32) -> (i32, i32, i32) {
    %c0_i32 = arith.constant 0 : i32
    %c0_i32_0 = arith.constant 0 : i32
    %c0_i32_1 = arith.constant 0 : i32
    return %arg0, %c0_i32, %c0_i32_0 : i32, i32, i32
  }
  func.func @transform_5(%arg0: i32) -> (i32, i32, i32) {
    %c0_i32 = arith.constant 0 : i32
    %c0_i32_0 = arith.constant 0 : i32
    %c0_i32_1 = arith.constant 0 : i32
    return %arg0, %c0_i32, %c0_i32_0 : i32, i32, i32
  }
  func.func @transform_6(%arg0: i32) -> (i32, i32, i32) {
    %c0_i32 = arith.constant 0 : i32
    %c0_i32_0 = arith.constant 0 : i32
    %c0_i32_1 = arith.constant 0 : i32
    return %arg0, %c0_i32, %c0_i32_0 : i32, i32, i32
  }
  func.func @transform_7(%arg0: i32) -> (i32, i32, i32) {
    %c0_i32 = arith.constant 0 : i32
    %c0_i32_0 = arith.constant 0 : i32
    %c0_i32_1 = arith.constant 0 : i32
    return %arg0, %c0_i32, %c0_i32_0 : i32, i32, i32
  }
  func.func @transform_8(%arg0: i32) -> (i32, i32, i32) {
    %c0_i32 = arith.constant 0 : i32
    %c0_i32_0 = arith.constant 0 : i32
    %c0_i32_1 = arith.constant 0 : i32
    return %arg0, %c0_i32, %c0_i32_0 : i32, i32, i32
  }
  func.func @transform_9(%arg0: i32) -> (i32, i32, i32) {
    %c0_i32 = arith.constant 0 : i32
    %c0_i32_0 = arith.constant 0 : i32
    %c0_i32_1 = arith.constant 0 : i32
    return %arg0, %c0_i32, %c0_i32_0 : i32, i32, i32
  }
  func.func @transform_10(%arg0: i32) -> (i32, i32, i32) {
    %c0_i32 = arith.constant 0 : i32
    %c0_i32_0 = arith.constant 0 : i32
    %c0_i32_1 = arith.constant 0 : i32
    return %arg0, %c0_i32, %c0_i32_0 : i32, i32, i32
  }
}

</mosaic_0001>

<bundles_post_ra>
// kernel: fused_losses.1
= control target key start
LH: loop header
LB: loop body
LE: loop exit
PB: predicated region body
PF: predicated region fallthrough
CT: control target
= control target key end

     0   :  { %v557_v3 = vmov 1   ;;  %vm83_vm8 = vcmask 15360   ;;  %vm57_vm9 = vcmask 23552   ;;  %vm130_vm10 = vcmask 253952   ;;  %s854_s3 = inlined_call_operand.vmem [shape: f32[2,8,2], index: 3, kind: input, shape index: {}]   ;;  %s855_s4 = inlined_call_operand.vmem [shape: f32[2,8,2], index: 4, kind: input, shape index: {}]   ;;  %s856_s5 = inlined_call_operand.vmem [shape: f32[2,1,32], index: 5, kind: input, shape index: {}]   ;;  %s857_s6 = inlined_call_operand.vmem [shape: f32[2,1,32], index: 6, kind: input, shape index: {}]   ;;  %s858_s0 = inlined_call_operand.vmem [shape: f32[2,8,3], index: 0, kind: input, shape index: {}]   ;;  %s859_s1 = inlined_call_operand.vmem [shape: f32[2,8,3], index: 1, kind: input, shape index: {}]   ;;  %s860_s8 = inlined_call_operand.vmem [shape: f32[2,1,45], index: 8, kind: input, shape index: {}]   ;;  %s861_s9 = inlined_call_operand.vmem [shape: f32[2,1,10], index: 9, kind: input, shape index: {}]   ;;  %s862_s2 = inlined_call_operand.vmem [shape: f32[2,8,1], index: 2, kind: input, shape index: {}]   ;;  %s863_s7 = inlined_call_operand.vmem [shape: f32[2,1,256], index: 7, kind: input, shape index: {}]   ;;  %s864_s10 = inlined_call_operand.vmem [shape: f32[1,2,8], index: 10, kind: output, shape index: {}]  }
   0x1   :  { %v50_v0 = vld [vmem:[%s854_s3 + $0x8] sm:$0xff]  ;;  %v49_v2 = vld [vmem:[%s854_s3] sm:$0xff]  ;;  %556 = vset.pattern.permute.xlu0 %v557_v3  ;;  %555 = vset.pattern.permute.xlu1 %v557_v3  ;;  %s558_s3 = smov 1   ;;  %vm455_vm11 = vcmask 360448   ;;  %vm464_vm12 = vcmask 73728   ;;  %vm66_vm15 = vcmask 7168  }
   0x2   :  { %v52_v1 = vld [vmem:[%s855_s4 + $0x8] sm:$0xff]  ;;  %v545_v4 = vtrunc.f32 %v50_v0  ;;  %v543_v6 = vtrunc.f32 %v49_v2  ;;  %v51_v7 = vld [vmem:[%s855_s4] sm:$0xff] }
   0x3   :  { %v549_v5 = vtrunc.f32 %v52_v1  ;;  %v547_v8 = vtrunc.f32 %v51_v7  ;;  %v53_v19 = vsub.f32 %v51_v7, %v49_v2  ;;  %v54_v24 = vsub.f32 %v52_v1, %v50_v0  ;;  %v43_v39 = vld [vmem:[%s858_s0] sm:$0xff]  ;;  %v44_v53 = vld [vmem:[%s858_s0 + $0x8] sm:$0xff] }
   0x4   :  { %v546_v9 = vcvt.f32.s32 %v545_v4  ;;  %v544_v11 = vcvt.f32.s32 %v543_v6  ;;  %v45_v40 = vld [vmem:[%s859_s1] sm:$0xff]  ;;  %v46_v54 = vld [vmem:[%s859_s1 + $0x8] sm:$0xff] }
   0x5   :  { %v550_v10 = vcvt.f32.s32 %v549_v5  ;;  %v548_v12 = vcvt.f32.s32 %v547_v8  ;;  %v81_v22 = vmul.f32 %v53_v19, %v53_v19  ;;  %v82_v25 = vmul.f32 %v54_v24, %v54_v24  ;;  %v121_v41 = vld [vmem:[%s856_s5 + $0x1] sm:$0x1]  ;;  %v120_v45 = vld [vmem:[%s856_s5] sm:$0x1] }
   0x6   :  { %vm146_vm0 = vcmp.gt.s32.totalorder %v546_v9, 0  ;;  %vm144_vm2 = vcmp.gt.s32.totalorder %v544_v11, 0  ;;  %v123_v42 = vld [vmem:[%s857_s6 + $0x1] sm:$0x1]  ;;  %v47_v43 = vsub.f32 %v43_v39, %v45_v40  ;;  %v122_v46 = vld [vmem:[%s857_s6] sm:$0x1]  ;;  %v48_v57 = vsub.f32 %v44_v53, %v46_v54 }
   0x7   :  { %vm311_vm1 = vcmp.gt.s32.totalorder %v550_v10, 0  ;;  %v147_v13 = vsel %vm146_vm0, %v546_v9, 0  ;;  %v145_v15 = vsel %vm144_vm2, %v544_v11, 0  ;;  %vm309_vm3 = vcmp.gt.s32.totalorder %v548_v12, 0  ;;  %v449_v58 = vld [vmem:[%s860_s8] sm:$0x1] }
   0x8   :  { %v312_v14 = vsel %vm311_vm1, %v550_v10, 0  ;;  %vm150_vm4 = vcmp.lt.s32.totalorder %v147_v13, 15  ;;  %vm148_vm6 = vcmp.lt.s32.totalorder %v145_v15, 15  ;;  %v310_v16 = vsel %vm309_vm3, %v548_v12, 0  ;;  %v450_v62 = vld [vmem:[%s860_s8 + $0x1] sm:$0x1] }
   0x9   :  { %vm315_vm5 = vcmp.lt.s32.totalorder %v312_v14, 15  ;;  %v151_v17 = vsel %vm150_vm4, %v147_v13, 15  ;;  %v149_v18 = vsel %vm148_vm6, %v145_v15, 15  ;;  %vm313_vm7 = vcmp.lt.s32.totalorder %v310_v16, 15  ;;  %v452_v2 = vld [vmem:[%s861_s9 + $0x1] sm:$0x1] }
   0xa   :  { %156 = vrot.lane.b32.xlu0 %v151_v17, %s558_s3  ;;  %154 = vrot.lane.b32.xlu1 %v149_v18, %s558_s3  ;;  %v316_v20 = vsel %vm315_vm5, %v312_v14, 15  ;;  %v314_v21 = vsel %vm313_vm7, %v310_v16, 15  ;;  %v84_v23 = vsel %vm83_vm8, %v81_v22, 0.0  ;;  %v87_v26 = vsel %vm83_vm8, %v82_v25, 0.0  ;;  %v451_v5 = vld [vmem:[%s861_s9] sm:$0x1] }
   0xb   :  { %v153_v27 = vmul.u32 16, %v151_v17  ;;  %v318_v31 = vmul.u32 16, %v316_v20  ;;  %v125_v44 = vsub.f32 %v121_v41, %v123_v42  ;;  %v55_v47 = vmul.f32 %v47_v43, %v47_v43  ;;  %v36_v9 = vld [vmem:[%s862_s2 + $0x8] sm:$0xff]  ;;  %v35_v10 = vld [vmem:[%s862_s2] sm:$0xff] }
   0xc   :  { %v317_v32 = vmul.u32 16, %v314_v21  ;;  %v152_v33 = vmul.u32 16, %v149_v18  ;;  %v124_v49 = vsub.f32 %v120_v45, %v122_v46  ;;  %v453_v60 = vmul.f32 %v449_v58, %v449_v58  ;;  %v138_v25 = vld [vmem:[%s863_s7 + $0x2] sm:$0x3] }
   0xd   :  { %v127_v48 = vadd.f32 1e-06, %v125_v44  ;;  %v58_v50 = vsel %vm57_vm9, %v55_v47, 0.0  ;;  %v56_v61 = vmul.f32 %v48_v57, %v48_v57  ;;  %v454_v1 = vmul.f32 %v450_v62, %v450_v62 }
   0xe   :  { %321 = vrot.lane.b32.xlu0 %v316_v20, %s558_s3  ;;  %319 = vrot.lane.b32.xlu1 %v314_v21, %s558_s3  ;;  %v126_v52 = vadd.f32 1e-06, %v124_v49  ;;  %v456_v63 = vsel %vm455_vm11, %v453_v60, 0.0  ;;  %v463_v4 = vmul.f32 %v452_v2, %v452_v2  ;;  %v462_v7 = vmul.f32 %v451_v5, %v451_v5 }
   0xf   :  { %v129_v51 = vmul.f32 %v127_v48, %v127_v48  ;;  %v61_v0 = vsel %vm57_vm9, %v56_v61, 0.0  ;;  %v459_v3 = vsel %vm455_vm11, %v454_v1, 0.0  ;;  %vm38_vm13 = vcmp.ne.f32.partialorder %v36_v9, 0.0 }
  0x10   :  { %v128_v56 = vmul.f32 %v126_v52, %v126_v52  ;;  %v468_v6 = vsel %vm464_vm12, %v463_v4, 0.0  ;;  %v465_v8 = vsel %vm464_vm12, %v462_v7, 0.0  ;;  %vm37_vm14 = vcmp.ne.f32.partialorder %v35_v10, 0.0 }
  0x11   :  { %v134_v55 = vsel %vm130_vm10, %v129_v51, 0.0  ;;  %v559_v11 = vmov 0.0   ;;  %v139_v14 = vlaneseq  ;;  %vm296_vm8 = vcmask 1040384  }
  0x12   :  { %v131_v59 = vsel %vm130_vm10, %v128_v56, 0.0  ;;  %v676_v12 = vsel %vm38_vm13, 1.0, %v559_v11  ;;  %v680_v15 = vsel %vm37_vm14, 1.0, %v559_v11  ;;  %vm473_vm9 = vcmask 1041409  }
  0x13   :  { %v113_v13 = vsel %vm66_vm15, %v676_v12, 0.0  ;;  %v106_v16 = vsel %vm66_vm15, %v680_v15, 0.0  ;;  %v273_v18 = vshrl.u32 %v139_v14, 7  ;;  %v140_v19 = vand.u32 127, %v139_v14 }
  0x14   :  { %v114_v17 = vrot.slane %v113_v13, 4  ;;  %v107_v21 = vrot.slane %v106_v16, 4  ;;  %vm476_vm10 = vcmask 1024   ;;  %vm484_vm11 = vcmask 9224  }
  0x15   :  { %v141_v24 = vadd.s32 128, %v140_v19  ;;  %vm492_vm12 = vcmask 17424   ;;  %vm499_vm13 = vcmask 25624   ;;  %vm506_vm14 = vcmask 33824  }
  0x16   :  { %v686_v22 = vadd.f32 %v114_v17, %v113_v13 }
  0x2d   :  { %88 = vadd.xlane.f32.xlu0 %v87_v26  ;;  %v278_v26 = vsub.s32 1, %v273_v18 }
  0x7c   :  { %v157_v28 = vpop.permute.xlu0 %156  ;;  %v155_v29 = vpop.permute.xlu1 %154 }
  0x7d   :  { %v159_v30 = vadd.s32 %v157_v28, %v153_v27  ;;  %v158_v38 = vadd.s32 %v155_v29, %v152_v33  ;;  %v137_v27 = vld [vmem:[%s863_s7] sm:$0x3]  ;;  %v694_v28 = vadd.f32 %v107_v21, %v106_v16  ;;  %v116_v29 = vrot.slane %v686_v22, 2  ;;  %s560_s7 = smov 2  }
  0x7f   :  { %164 = vperm.xlu0 %556, %v159_v30  }
  0x80   :  { %v322_v34 = vpop.permute.xlu0 %321  ;;  %v320_v35 = vpop.permute.xlu1 %319 }
  0x81   :  { %v324_v36 = vadd.s32 %v322_v34, %v318_v31  ;;  %v323_v37 = vadd.s32 %v320_v35, %v317_v32  ;;  %v699_v32 = vrot.slane %v138_v25, %v278_v26 }
  0x83   :  { %329 = vperm.xlu1 %555, %v324_v36   ;;  %326 = vperm.xlu0 %556, %v323_v37   ;;  %v707_v36 = vrot.slane %v137_v27, %v278_v26  ;;  %v109_v37 = vrot.slane %v694_v28, 2 }
  0x87   :  { %161 = vperm.xlu1 %555, %v158_v38  }
  0xa2   :  { %59 = vadd.xlane.f32.xlu0 %v58_v50 }
  0xa6   :  { %135 = vadd.xlane.f32.xlu0 %v134_v55 }
  0xaa   :  { %132 = vadd.xlane.f32.xlu0 %v131_v59 }
  0xab   :  { %85 = vadd.xlane.f32.xlu1 %v84_v23  ;;  %v274_v23 = vsub.s32 0, %v273_v18 }
  0xad   :  { %v697_v31 = vrot.slane %v138_v25, %v274_v23  ;;  %v701_v33 = vrot.slane %v137_v27, %v274_v23 }
  0xae   :  { %457 = vadd.xlane.f32.xlu0 %v456_v63 }
  0xaf   :  { %62 = vadd.xlane.f32.xlu1 %v61_v0 }
  0xb3   :  { %460 = vadd.xlane.f32.xlu1 %v459_v3 }
  0xb6   :  { %v684_v20 = vpop.xlane.xlu0 %88 }
  0xb7   :  { %469 = vadd.xlane.f32.xlu1 %v468_v6 }
  0xbb   :  { %466 = vadd.xlane.f32.xlu1 %v465_v8 }
  0xfa   :  { %v165_v30 = vpop.permute.xlu0 %164 }
  0xfb   :  { %vm168_vm0 = vcmp.eq.s32.totalorder %v140_v19, %v165_v30  ;;  %vm169_vm1 = vcmp.eq.s32.totalorder %v141_v24, %v165_v30 }
  0xfc   :  { %v703_v34 = vsel %vm168_vm0, 1.0, %v559_v11  ;;  %v705_v35 = vsel %vm169_vm1, 1.0, %v559_v11  ;;  %vm520_vm0 = vcmask 50224   ;;  %vm527_vm1 = vcmask 58424  }
  0xfd   :  { %v188_v38 = vrot.slane %v703_v34, 1  ;;  %v189_v39 = vrot.slane %v705_v35, 1  ;;  %v200_v40 = vrot.slane %v703_v34, 2  ;;  %v201_v41 = vrot.slane %v705_v35, 2 }
  0xfe   :  { %v330_v42 = vpop.permute.xlu1 %329  ;;  %v327_v43 = vpop.permute.xlu0 %326  ;;  %v212_v44 = vrot.slane %v703_v34, 3  ;;  %v213_v45 = vrot.slane %v705_v35, 3  ;;  %v224_v46 = vrot.slane %v703_v34, 4  ;;  %v225_v47 = vrot.slane %v705_v35, 4 }
  0xff   :  { %vm333_vm2 = vcmp.eq.s32.totalorder %v140_v19, %v330_v42  ;;  %vm334_vm3 = vcmp.eq.s32.totalorder %v141_v24, %v330_v42  ;;  %vm331_vm4 = vcmp.eq.s32.totalorder %v140_v19, %v327_v43  ;;  %vm332_vm5 = vcmp.eq.s32.totalorder %v141_v24, %v327_v43 }
 0x100   :  { %v718_v48 = vsel %vm333_vm2, 1.0, %v559_v11  ;;  %v720_v49 = vsel %vm334_vm3, 1.0, %v559_v11  ;;  %v722_v50 = vsel %vm331_vm4, 1.0, %v559_v11  ;;  %v724_v51 = vsel %vm332_vm5, 1.0, %v559_v11 }
 0x101   :  { %v353_v52 = vrot.slane %v718_v48, 1  ;;  %v354_v53 = vrot.slane %v720_v49, 1  ;;  %v351_v54 = vrot.slane %v722_v50, 1  ;;  %v352_v55 = vrot.slane %v724_v51, 1 }
 0x102   :  { %v162_v56 = vpop.permute.xlu1 %161  ;;  %v196_v57 = vadd.f32 %v703_v34, %v188_v38  ;;  %v197_v58 = vadd.f32 %v705_v35, %v189_v39  ;;  %v236_v59 = vrot.slane %v703_v34, 5  ;;  %v237_v60 = vrot.slane %v705_v35, 5 }
 0x103   :  { %vm166_vm6 = vcmp.eq.s32.totalorder %v140_v19, %v162_v56  ;;  %vm167_vm7 = vcmp.eq.s32.totalorder %v141_v24, %v162_v56  ;;  %v248_v61 = vrot.slane %v703_v34, 6  ;;  %v249_v62 = vrot.slane %v705_v35, 6 }
 0x104   :  { %v736_v63 = vsel %vm166_vm6, 1.0, %v559_v11  ;;  %v738_v0 = vsel %vm167_vm7, 1.0, %v559_v11  ;;  %v208_v1 = vadd.f32 %v200_v40, %v196_v57  ;;  %v209_v2 = vadd.f32 %v201_v41, %v197_v58 }
 0x105   :  { %v186_v3 = vrot.slane %v736_v63, 1  ;;  %v187_v4 = vrot.slane %v738_v0, 1  ;;  %v260_v5 = vrot.slane %v703_v34, 7  ;;  %v261_v6 = vrot.slane %v705_v35, 7 }
 0x106   :  { %v220_v7 = vadd.f32 %v212_v44, %v208_v1  ;;  %v221_v8 = vadd.f32 %v213_v45, %v209_v2  ;;  %v361_v9 = vadd.f32 %v718_v48, %v353_v52  ;;  %v362_v10 = vadd.f32 %v720_v49, %v354_v53 }
 0x107   :  { %v365_v11 = vrot.slane %v718_v48, 2  ;;  %v366_v13 = vrot.slane %v720_v49, 2  ;;  %v377_v14 = vrot.slane %v718_v48, 3  ;;  %v378_v16 = vrot.slane %v720_v49, 3 }
 0x108   :  { %v232_v17 = vadd.f32 %v224_v46, %v220_v7  ;;  %v233_v18 = vadd.f32 %v225_v47, %v221_v8  ;;  %v389_v19 = vrot.slane %v718_v48, 4  ;;  %v390_v21 = vrot.slane %v720_v49, 4 }
 0x109   :  { %v373_v23 = vadd.f32 %v365_v11, %v361_v9  ;;  %v374_v24 = vadd.f32 %v366_v13, %v362_v10  ;;  %v401_v25 = vrot.slane %v718_v48, 5  ;;  %v402_v26 = vrot.slane %v720_v49, 5 }
 0x10a   :  { %v244_v27 = vadd.f32 %v236_v59, %v232_v17  ;;  %v245_v30 = vadd.f32 %v237_v60, %v233_v18  ;;  %v413_v34 = vrot.slane %v718_v48, 6  ;;  %v414_v35 = vrot.slane %v720_v49, 6 }
 0x10b   :  { %v385_v38 = vadd.f32 %v377_v14, %v373_v23  ;;  %v386_v39 = vadd.f32 %v378_v16, %v374_v24  ;;  %v425_v40 = vrot.slane %v718_v48, 7  ;;  %v426_v41 = vrot.slane %v720_v49, 7 }
 0x10c   :  { %v256_v42 = vadd.f32 %v248_v61, %v244_v27  ;;  %v257_v43 = vadd.f32 %v249_v62, %v245_v30  ;;  %v194_v44 = vadd.f32 %v736_v63, %v186_v3  ;;  %v195_v45 = vadd.f32 %v738_v0, %v187_v4 }
 0x10d   :  { %v397_v46 = vadd.f32 %v389_v19, %v385_v38  ;;  %v398_v47 = vadd.f32 %v390_v21, %v386_v39  ;;  %v198_v52 = vrot.slane %v736_v63, 2  ;;  %v199_v53 = vrot.slane %v738_v0, 2 }
 0x10e   :  { %v268_v56 = vadd.f32 %v260_v5, %v256_v42  ;;  %v269_v57 = vadd.f32 %v261_v6, %v257_v43  ;;  %v210_v58 = vrot.slane %v736_v63, 3  ;;  %v211_v48 = vrot.slane %v738_v0, 3 }
 0x10f   :  { %v409_v59 = vadd.f32 %v401_v25, %v397_v46  ;;  %v410_v49 = vadd.f32 %v402_v26, %v398_v47  ;;  %v206_v60 = vadd.f32 %v198_v52, %v194_v44  ;;  %v207_v61 = vadd.f32 %v199_v53, %v195_v45 }
 0x110   :  { %v294_v62 = vmul.f32 %v697_v31, %v268_v56  ;;  %v295_v1 = vmul.f32 %v699_v32, %v269_v57  ;;  %v222_v2 = vrot.slane %v736_v63, 4  ;;  %v223_v3 = vrot.slane %v738_v0, 4 }
 0x111   :  { %v421_v4 = vadd.f32 %v413_v34, %v409_v59  ;;  %v422_v7 = vadd.f32 %v414_v35, %v410_v49  ;;  %v218_v5 = vadd.f32 %v210_v58, %v206_v60  ;;  %v219_v6 = vadd.f32 %v211_v48, %v207_v61 }
 0x112   :  { %v302_v8 = vsel %vm296_vm8, %v294_v62, 0.0  ;;  %v303_v9 = vsel %vm296_vm8, %v295_v1, 0.0  ;;  %v234_v10 = vrot.slane %v736_v63, 5  ;;  %v235_v11 = vrot.slane %v738_v0, 5 }
 0x113   :  { %v304_v13 = vadd.f32 %v303_v9, %v302_v8  ;;  %v433_v14 = vadd.f32 %v425_v40, %v421_v4  ;;  %v434_v16 = vadd.f32 %v426_v41, %v422_v7  ;;  %v230_v17 = vadd.f32 %v222_v2, %v218_v5 }
 0x114   :  { %v231_v18 = vadd.f32 %v223_v3, %v219_v6  ;;  %v246_v19 = vrot.slane %v736_v63, 6  ;;  %v247_v21 = vrot.slane %v738_v0, 6  ;;  %v258_v23 = vrot.slane %v736_v63, 7 }
 0x115   :  { %305 = vadd.xlane.f32.xlu1 %v304_v13  ;;  %v437_v24 = vmul.f32 %v433_v14, %v697_v31  ;;  %v438_v25 = vmul.f32 %v434_v16, %v699_v32  ;;  %v242_v26 = vadd.f32 %v234_v10, %v230_v17  ;;  %v259_v27 = vrot.slane %v738_v0, 7 }
 0x116   :  { %v243_v30 = vadd.f32 %v235_v11, %v231_v18  ;;  %v359_v34 = vadd.f32 %v722_v50, %v351_v54  ;;  %v360_v35 = vadd.f32 %v724_v51, %v352_v55  ;;  %v363_v38 = vrot.slane %v722_v50, 2 }
 0x117   :  { %v444_v63 = vsel %vm296_vm8, %v437_v24, 0.0  ;;  %v445_v31 = vsel %vm296_vm8, %v438_v25, 0.0  ;;  %v254_v39 = vadd.f32 %v246_v19, %v242_v26  ;;  %v364_v32 = vrot.slane %v724_v51, 2 }
 0x118   :  { %v446_v40 = vadd.f32 %v445_v31, %v444_v63  ;;  %v255_v0 = vadd.f32 %v247_v21, %v243_v30  ;;  %v371_v41 = vadd.f32 %v363_v38, %v359_v34  ;;  %v375_v42 = vrot.slane %v722_v50, 3 }
 0x119   :  { %v266_v43 = vadd.f32 %v258_v23, %v254_v39  ;;  %v372_v54 = vadd.f32 %v364_v32, %v360_v35  ;;  %v376_v44 = vrot.slane %v724_v51, 3  ;;  %v387_v55 = vrot.slane %v722_v50, 4 }
 0x11a   :  { %447 = vadd.xlane.f32.xlu1 %v446_v40  ;;  %v267_v45 = vadd.f32 %v259_v27, %v255_v0  ;;  %v383_v46 = vadd.f32 %v375_v42, %v371_v41  ;;  %v388_v47 = vrot.slane %v724_v51, 4  ;;  %v399_v52 = vrot.slane %v722_v50, 5 }
 0x11b   :  { %v117_v53 = vadd.f32 %v116_v29, %v686_v22  ;;  %v292_v56 = vmul.f32 %v701_v33, %v266_v43  ;;  %v384_v57 = vadd.f32 %v376_v44, %v372_v54  ;;  %v400_v58 = vrot.slane %v724_v51, 5 }
 0x11c   :  { %v293_v48 = vmul.f32 %v707_v36, %v267_v45  ;;  %v395_v59 = vadd.f32 %v387_v55, %v383_v46  ;;  %v411_v49 = vrot.slane %v722_v50, 6  ;;  %v110_v60 = vadd.f32 %v109_v37, %v694_v28 }
 0x11d   :  { %v297_v61 = vsel %vm296_vm8, %v292_v56, 0.0  ;;  %v396_v62 = vadd.f32 %v388_v47, %v384_v57  ;;  %v412_v1 = vrot.slane %v724_v51, 6  ;;  %v423_v2 = vrot.slane %v722_v50, 7 }
 0x11e   :  { %v298_v22 = vsel %vm296_vm8, %v293_v48, 0.0  ;;  %v407_v29 = vadd.f32 %v399_v52, %v395_v59  ;;  %v424_v7 = vrot.slane %v724_v51, 7  ;;  %v111_v6 = vrot.slane %v110_v60, 1 }
 0x11f   :  { %v299_v3 = vadd.f32 %v298_v22, %v297_v61  ;;  %v408_v4 = vadd.f32 %v400_v58, %v396_v62  ;;  %v118_v8 = vrot.slane %v117_v53, 1  ;;  %v91_v16 = vmul.f32 %v676_v12, %v684_v20 }
 0x120   :  { %v419_v5 = vadd.f32 %v411_v49, %v407_v29  ;;  %v112_v11 = vadd.f32 %v111_v6, %v110_v60 }
 0x121   :  { %300 = vadd.xlane.f32.xlu0 %v299_v3  ;;  %v420_v9 = vadd.f32 %v412_v1, %v408_v4  ;;  %v119_v13 = vadd.f32 %v118_v8, %v117_v53  ;;  %v99_v19 = vsel %vm66_vm15, %v91_v16, 0.0 }
 0x122   :  { %v431_v28 = vadd.f32 %v423_v2, %v419_v5 }
 0x123   :  { %v432_v37 = vadd.f32 %v424_v7, %v420_v9  ;;  %v488_v18 = vsel %vm473_vm9, %v119_v13, %v112_v11 }
 0x124   :  { %v435_v10 = vmul.f32 %v431_v28, %v701_v33 }
 0x125   :  { %v436_v14 = vmul.f32 %v432_v37, %v707_v36  ;;  %v100_v36 = vrot.slane %v99_v19, 4 }
 0x126   :  { %v439_v50 = vsel %vm296_vm8, %v435_v10, 0.0 }
 0x127   :  { %v440_v51 = vsel %vm296_vm8, %v436_v14, 0.0  ;;  %v101_v25 = vadd.f32 %v100_v36, %v99_v19 }
 0x128   :  { %v441_v17 = vadd.f32 %v440_v51, %v439_v50 }
 0x129   :  { %v102_v30 = vrot.slane %v101_v25, 2 }
 0x12a   :  { %442 = vadd.xlane.f32.xlu0 %v441_v17 }
 0x12b   :  { %489 = vrot.lane.b32.xlu1 %v488_v18, %s560_s7  ;;  %v60_v33 = vpop.xlane.xlu0 %59  ;;  %v103_v39 = vadd.f32 %v102_v30, %v101_v25 }
 0x12c   :  { %v64_v21 = vmul.f32 %v680_v15, %v60_v33 }
 0x12d   :  { %v104_v43 = vrot.slane %v103_v39, 1 }
 0x12e   :  { %v67_v23 = vsel %vm66_vm15, %v64_v21, 0.0 }
 0x12f   :  { %v68_v24 = vrot.slane %v67_v23, 4  ;;  %v105_v47 = vadd.f32 %v104_v43, %v103_v39  ;;  %v136_v59 = vpop.xlane.xlu0 %135 }
 0x130   :  { %v496_v3 = vrot.slane %v136_v59, 7 }
 0x131   :  { %v69_v20 = vadd.f32 %v68_v24, %v67_v23 }
 0x133   :  { %v70_v63 = vrot.slane %v69_v20, 2  ;;  %v133_v60 = vpop.xlane.xlu0 %132 }
 0x134   :  { %v86_v26 = vpop.xlane.xlu1 %85  ;;  %v497_v9 = vsel %vm473_vm9, %v496_v3, %v133_v60 }
 0x135   :  { %v90_v27 = vmul.f32 %v680_v15, %v86_v26  ;;  %v71_v42 = vadd.f32 %v70_v63, %v69_v20 }
 0x137   :  { %v92_v34 = vsel %vm66_vm15, %v90_v27, 0.0  ;;  %v72_v45 = vrot.slane %v71_v42, 1  ;;  %v458_v62 = vpop.xlane.xlu0 %457 }
 0x138   :  { %v93_v35 = vrot.slane %v92_v34, 4  ;;  %v63_v38 = vpop.xlane.xlu1 %62 }
 0x139   :  { %v65_v31 = vmul.f32 %v676_v12, %v63_v38  ;;  %v73_v12 = vadd.f32 %v72_v45, %v71_v42 }
 0x13a   :  { %v94_v32 = vadd.f32 %v93_v35, %v92_v34 }
 0x13b   :  { %v74_v40 = vsel %vm66_vm15, %v65_v31, 0.0  ;;  %vm513_vm15 = vcmask 42024  }
 0x13c   :  { %v95_v0 = vrot.slane %v94_v32, 2  ;;  %v75_v41 = vrot.slane %v74_v40, 4  ;;  %v461_v48 = vpop.xlane.xlu1 %460 }
 0x13d   :  { %v517_v5 = vrot.slane %v461_v48, 7 }
 0x13e   :  { %v96_v54 = vadd.f32 %v95_v0, %v94_v32  ;;  %v76_v44 = vadd.f32 %v75_v41, %v74_v40 }
 0x13f   :  { %v518_v11 = vsel %vm473_vm9, %v517_v5, %v458_v62 }
 0x140   :  { %v97_v55 = vrot.slane %v96_v54, 1  ;;  %v77_v15 = vrot.slane %v76_v44, 2  ;;  %v470_v49 = vpop.xlane.xlu1 %469 }
 0x141   :  { %v524_v8 = vrot.slane %v470_v49, 7 }
 0x142   :  { %v98_v46 = vadd.f32 %v97_v55, %v96_v54  ;;  %v78_v52 = vadd.f32 %v77_v15, %v76_v44 }
 0x144   :  { %v480_v53 = vsel %vm473_vm9, %v105_v47, %v98_v46  ;;  %v79_v56 = vrot.slane %v78_v52, 1  ;;  %v467_v61 = vpop.xlane.xlu1 %466 }
 0x145   :  { %481 = vrot.lane.b32.xlu0 %v480_v53, %s558_s3  ;;  %v525_v13 = vsel %vm473_vm9, %v524_v8, %v467_v61 }
 0x146   :  { %v80_v57 = vadd.f32 %v79_v56, %v78_v52 }
 0x148   :  { %v474_v58 = vsel %vm473_vm9, %v80_v57, %v73_v12 }
 0x149   :  { %477 = vst.msk [vmem:[%s864_s10] sm:$0x3] %vm476_vm10, %v474_v58 }
 0x19e   :  { %v306_v1 = vpop.xlane.xlu1 %305 }
 0x19f   :  { %v503_v6 = vrot.slane %v306_v1, 7 }
 0x1a3   :  { %v448_v29 = vpop.xlane.xlu1 %447 }
 0x1a4   :  { %v510_v28 = vrot.slane %v448_v29, 7 }
 0x1a7   :  { %v490_v4 = vpop.permute.xlu1 %489 }
 0x1aa   :  { %v301_v22 = vpop.xlane.xlu0 %300 }
 0x1ab   :  { %v504_v37 = vsel %vm473_vm9, %v503_v6, %v301_v22 }
 0x1b3   :  { %v443_v2 = vpop.xlane.xlu0 %442 }
 0x1b4   :  { %v511_v10 = vsel %vm473_vm9, %v510_v28, %v443_v2 }
 0x1b7   :  { %v482_v7 = vpop.permute.xlu0 %481 }
 0x1b8   :  { %485 = vst.msk [vmem:[%s864_s10] sm:$0x3] %vm484_vm11, %v482_v7 }
 0x1b9   :  { %493 = vst.msk [vmem:[%s864_s10] sm:$0x3] %vm492_vm12, %v490_v4 }
 0x1ba   :  { %500 = vst.msk [vmem:[%s864_s10] sm:$0x3] %vm499_vm13, %v497_v9 }
 0x1bb   :  { %507 = vst.msk [vmem:[%s864_s10] sm:$0x3] %vm506_vm14, %v504_v37 }
 0x1bc   :  { %514 = vst.msk [vmem:[%s864_s10] sm:$0x3] %vm513_vm15, %v511_v10 }
 0x1bd   :  { %521 = vst.msk [vmem:[%s864_s10] sm:$0x3] %vm520_vm0, %v518_v11 }
 0x1be   :  { %528 = vst.msk [vmem:[%s864_s10] sm:$0x3] %vm527_vm1, %v525_v13 }

</bundles_post_ra>
